<compile_context>
chip_gen: v7x
topology: tpu7x:2x2x1
jax: 0.10.0
libtpu: 0.0.40
codegen_flags: <defaults>
</compile_context>

<pallas_src>
import functools

import jax
import jax.numpy as jnp
from jax.experimental import pallas as pl
from jax.experimental.pallas import tpu as pltpu


def _se_kernel(x_ref, w1t_ref, b1_ref, w2t_ref, b2_ref, o_ref, *, inv_hw):
    # x_ref block: (Nb, C, HW) in the I/O dtype (f32 or bf16).

    # ---- squeeze: AdaptiveAvgPool2d(1) == mean over spatial ----
    # f32-accumulating reduce directly from the I/O-dtype block; no slab-sized
    # f32 copy is kept live across the excitation matmuls.
    y = jnp.sum(x_ref[...], axis=-1, dtype=jnp.float32) * inv_hw          # (Nb, C)

    # ---- excitation (1x1 convs on a 1x1 map == dense), batched over Nb ----
    h = jnp.dot(y, w1t_ref[...],
                preferred_element_type=jnp.float32) + b1_ref[...]          # (Nb, Cr)
    h = h * jax.nn.sigmoid(h)                                              # SiLU
    s = jnp.dot(h, w2t_ref[...],
                preferred_element_type=jnp.float32) + b2_ref[...]          # (Nb, C)
    s = jax.nn.sigmoid(s)

    # ---- scale: re-read the block, broadcast per-channel gate over lanes ----
    o_ref[...] = (x_ref[...].astype(jnp.float32) * s[:, :, None]).astype(o_ref.dtype)


def _target_block_bytes():
    """Per-generation per-step input-slab target (amortize ~0.35us/step)."""
    try:
        kind = jax.devices()[0].device_kind.lower()
    except Exception:
        kind = ""
    if "v7" in kind:
        return 8 << 20   # 3.2 TB/s HBM: 2 MiB steps would be ~25-30% overhead
    if "v6" in kind:
        return 4 << 20
    if "v5" in kind:
        return 2 << 20   # ~820 GB/s: step overhead already ~7% at 2 MiB
    return 4 << 20


def se_block(x, w1, b1, w2, b2, *, samples_per_block=None):
    """x: (N, C, H, W) f32 or bf16.  w1: (Cr, C), b1: (Cr,), w2: (C, Cr), b2: (C,)."""
    N, C, H, W = x.shape
    HW = H * W
    Cr = w1.shape[0]

    # Un-padded layout: last two block dims equal the full array dims.
    xf = x.reshape(N, C, HW)

    if samples_per_block is None:
        bytes_per_sample = C * HW * x.dtype.itemsize
        nb = max(1, min(N, _target_block_bytes() // max(bytes_per_sample, 1)))
        # Keep >=2 (>=4 when N allows) grid steps: pipeline overlap + megacore.
        min_steps = 2 if N < 4 else 4
        nb = max(1, min(nb, -(-N // min_steps)))
    else:
        nb = max(1, min(N, samples_per_block))

    # Ragged last block instead of forcing nb | N; tail garbage rows are
    # row-independent and their out-of-bounds stores are dropped.
    grid = (pl.cdiv(N, nb),)

    # Small parameter tensors, kept resident in f32 (index_map constant).
    w1t = jnp.asarray(w1, jnp.float32).T            # (C, Cr)
    w2t = jnp.asarray(w2, jnp.float32).T            # (Cr, C)
    b1r = jnp.asarray(b1, jnp.float32).reshape(1, Cr)
    b2r = jnp.asarray(b2, jnp.float32).reshape(1, C)

    kernel = functools.partial(_se_kernel, inv_hw=1.0 / HW)

    out = pl.pallas_call(
        kernel,
        out_shape=jax.ShapeDtypeStruct((N, C, HW), x.dtype),
        grid=grid,
        in_specs=[
            pl.BlockSpec((nb, C, HW), lambda g: (g, 0, 0)),   # sample-group slab
            pl.BlockSpec((C, Cr), lambda g: (0, 0)),          # conv1 weight^T
            pl.BlockSpec((1, Cr), lambda g: (0, 0)),          # conv1 bias
            pl.BlockSpec((Cr, C), lambda g: (0, 0)),          # conv2 weight^T
            pl.BlockSpec((1, C), lambda g: (0, 0)),           # conv2 bias
        ],
        out_specs=pl.BlockSpec((nb, C, HW), lambda g: (g, 0, 0)),
        compiler_params=pltpu.CompilerParams(
            dimension_semantics=("parallel",),
            # Room for the largest (v7x, 8 MiB) slab's double buffers + f32
            # temps on every generation; <= physical VMEM on v5e/v6e/v7x.
            vmem_limit_bytes=48 << 20,
        ),
    )(xf, w1t, b1r, w2t, b2r)

    return out.reshape(N, C, H, W)


def se_block_ref(x, w1, b1, w2, b2):
    """Pure-JAX reference matching the PyTorch SEBlock forward (f32 compute)."""
    xf = x.astype(jnp.float32)
    y = jnp.mean(xf, axis=(2, 3))                             # (N, C)
    h = y @ w1.T + b1                                         # (N, Cr)
    h = h * jax.nn.sigmoid(h)                                 # SiLU
    s = jax.nn.sigmoid(h @ w2.T + b2)                         # (N, C)
    return xf * s[:, :, None, None]


if __name__ == "__main__":
    # SEBlock(in_channels=48, r=24) -> reduced channels = 2
    N, C, H, W = 2, 48, 16, 16
    r = 24
    Cr = C // r

    key = jax.random.PRNGKey(0)
    kx, k1, k2, k3, k4 = jax.random.split(key, 5)

    x = jax.random.normal(kx, (N, C, H, W), dtype=jnp.float32)
    w1 = jax.random.normal(k1, (Cr, C), dtype=jnp.float32) * 0.1
    b1 = jax.random.normal(k2, (Cr,), dtype=jnp.float32) * 0.1
    w2 = jax.random.normal(k3, (C, Cr), dtype=jnp.float32) * 0.1
    b2 = jax.random.normal(k4, (C,), dtype=jnp.float32) * 0.1

    # ---- f32 I/O (matches PyTorch semantics) ----
    out = jax.block_until_ready(se_block(x, w1, b1, w2, b2))
    ref = se_block_ref(x, w1, b1, w2, b2)
    assert out.shape == (N, C, H, W)
    assert jnp.allclose(out, ref, atol=1e-5, rtol=1e-5), "f32 mismatch vs reference"

    # ---- bf16 I/O (halves HBM bytes; compute stays f32 in-kernel) ----
    x_bf16 = x.astype(jnp.bfloat16)
    out_bf = jax.block_until_ready(se_block(x_bf16, w1, b1, w2, b2))
    ref_bf = se_block_ref(x_bf16.astype(jnp.float32), w1, b1, w2, b2)
    assert out_bf.dtype == jnp.bfloat16
    assert jnp.allclose(out_bf.astype(jnp.float32), ref_bf,
                        atol=5e-2, rtol=5e-2), "bf16 mismatch vs reference"

    # ---- non-128-multiple spatial: no pad round-trip, masked lane-tail store ----
    H2 = W2 = 9                                                # HW = 81
    x2 = jax.random.normal(kx, (N, C, H2, W2), dtype=jnp.float32)
    out2 = jax.block_until_ready(se_block(x2, w1, b1, w2, b2))
    ref2 = se_block_ref(x2, w1, b1, w2, b2)
    assert jnp.allclose(out2, ref2, atol=1e-5, rtol=1e-5), "non-128 HW mismatch"

    # ---- ragged grid path (N=3, nb=2 -> cdiv grid with a partial tail block) ----
    x3 = jax.random.normal(kx, (3, C, H, W), dtype=jnp.float32)
    out3 = jax.block_until_ready(se_block(x3, w1, b1, w2, b2, samples_per_block=2))
    ref3 = se_block_ref(x3, w1, b1, w2, b2)
    assert jnp.allclose(out3, ref3, atol=1e-5, rtol=1e-5), "ragged-grid mismatch"

    print("KERNEL_OK")
</pallas_src>

<mosaic_0001>
module attributes {stable_mosaic.version = 11 : i64} {
  func.func @_se_kernel(%arg0: i32, %arg1: memref<1x48x256xf32, #tpu.memory_space<vmem>>, %arg2: memref<48x2xf32, #tpu.memory_space<vmem>>, %arg3: memref<1x2xf32, #tpu.memory_space<vmem>>, %arg4: memref<2x48xf32, #tpu.memory_space<vmem>>, %arg5: memref<1x48xf32, #tpu.memory_space<vmem>>, %arg6: memref<1x48x256xf32, #tpu.memory_space<vmem>>) attributes {dimension_semantics = [#tpu.dimension_semantics<parallel>], iteration_bounds = array<i64: 2>, scalar_prefetch = 0 : i64, scratch_operands = 0 : i64, tpu.core_type = #tpu.core_type<tc>, window_params = [{transform_indices = @transform_0, window_bounds = array<i64: 1, 48, 256>}, {pipeline_mode = #tpu.pipeline_mode<synchronous>, transform_indices = @transform_1, window_bounds = array<i64: 48, 2>}, {pipeline_mode = #tpu.pipeline_mode<synchronous>, transform_indices = @transform_2, window_bounds = array<i64: 1, 2>}, {pipeline_mode = #tpu.pipeline_mode<synchronous>, transform_indices = @transform_3, window_bounds = array<i64: 2, 48>}, {pipeline_mode = #tpu.pipeline_mode<synchronous>, transform_indices = @transform_4, window_bounds = array<i64: 1, 48>}, {transform_indices = @transform_5, window_bounds = array<i64: 1, 48, 256>}]} {
    %c0 = arith.constant 0 : index
    %c0_0 = arith.constant 0 : index
    %c0_1 = arith.constant 0 : index
    %0 = vector.load %arg1[%c0, %c0_0, %c0_1] : memref<1x48x256xf32, #tpu.memory_space<vmem>>, vector<1x48x256xf32>
    %cst = arith.constant dense<0.000000e+00> : vector<1x48xf32>
    %1 = vector.multi_reduction <add>, %0, %cst [2] : vector<1x48x256xf32> to vector<1x48xf32>
    %cst_2 = arith.constant 3.906250e-03 : f32
    %2 = vector.broadcast %cst_2 : f32 to vector<1x48xf32>
    %3 = arith.mulf %1, %2 : vector<1x48xf32>
    %c0_3 = arith.constant 0 : index
    %c0_4 = arith.constant 0 : index
    %4 = vector.load %arg2[%c0_3, %c0_4] : memref<48x2xf32, #tpu.memory_space<vmem>>, vector<48x2xf32>
    %cst_5 = arith.constant dense<0.000000e+00> : vector<1x2xf32>
    %5 = tpu.matmul %3, %4, %cst_5 {dimension_numbers = #tpu.dot_dimension_numbers<[1], [0], [0], [1], [0, 0, 1, 1], [], []>} : vector<1x48xf32>, vector<48x2xf32>, vector<1x2xf32> -> vector<1x2xf32>
    %c0_6 = arith.constant 0 : index
    %c0_7 = arith.constant 0 : index
    %6 = vector.load %arg3[%c0_6, %c0_7] : memref<1x2xf32, #tpu.memory_space<vmem>>, vector<1x2xf32>
    %7 = arith.addf %5, %6 : vector<1x2xf32>
    %8 = arith.negf %7 : vector<1x2xf32>
    %9 = math.exp %8 : vector<1x2xf32>
    %cst_8 = arith.constant 1.000000e+00 : f32
    %10 = vector.broadcast %cst_8 : f32 to vector<1x2xf32>
    %11 = arith.addf %10, %9 : vector<1x2xf32>
    %12 = arith.divf %10, %11 : vector<1x2xf32>
    %13 = arith.mulf %7, %12 : vector<1x2xf32>
    %c0_9 = arith.constant 0 : index
    %c0_10 = arith.constant 0 : index
    %14 = vector.load %arg4[%c0_9, %c0_10] : memref<2x48xf32, #tpu.memory_space<vmem>>, vector<2x48xf32>
    %cst_11 = arith.constant dense<0.000000e+00> : vector<1x48xf32>
    %15 = tpu.matmul %13, %14, %cst_11 {dimension_numbers = #tpu.dot_dimension_numbers<[1], [0], [0], [1], [0, 0, 1, 1], [], []>} : vector<1x2xf32>, vector<2x48xf32>, vector<1x48xf32> -> vector<1x48xf32>
    %c0_12 = arith.constant 0 : index
    %c0_13 = arith.constant 0 : index
    %16 = vector.load %arg5[%c0_12, %c0_13] : memref<1x48xf32, #tpu.memory_space<vmem>>, vector<1x48xf32>
    %17 = arith.addf %15, %16 : vector<1x48xf32>
    %18 = arith.negf %17 : vector<1x48xf32>
    %19 = math.exp %18 : vector<1x48xf32>
    %cst_14 = arith.constant 1.000000e+00 : f32
    %20 = vector.broadcast %cst_14 : f32 to vector<1x48xf32>
    %21 = arith.addf %20, %19 : vector<1x48xf32>
    %22 = arith.divf %20, %21 : vector<1x48xf32>
    %c0_15 = arith.constant 0 : index
    %c0_16 = arith.constant 0 : index
    %c0_17 = arith.constant 0 : index
    %23 = vector.load %arg1[%c0_15, %c0_16, %c0_17] : memref<1x48x256xf32, #tpu.memory_space<vmem>>, vector<1x48x256xf32>
    %24 = vector.shape_cast %22 : vector<1x48xf32> to vector<1x48x1xf32>
    %25 = vector.broadcast %24 : vector<1x48x1xf32> to vector<1x48x256xf32>
    %26 = arith.mulf %23, %25 : vector<1x48x256xf32>
    %c0_18 = arith.constant 0 : index
    %c0_19 = arith.constant 0 : index
    %c0_20 = arith.constant 0 : index
    %27 = vector.load %arg6[%c0_18, %c0_19, %c0_20] : memref<1x48x256xf32, #tpu.memory_space<vmem>>, vector<1x48x256xf32>
    tpu.vector_store %arg6[%c0_18, %c0_19, %c0_20], %26 {strides = array<i32>} : memref<1x48x256xf32, #tpu.memory_space<vmem>>, vector<1x48x256xf32>,
    return
  }
  func.func @transform_0(%arg0: i32) -> (i32, i32, i32) {
    %c0_i32 = arith.constant 0 : i32
    %c0_i32_0 = arith.constant 0 : i32
    %c0_i32_1 = arith.constant 0 : i32
    return %arg0, %c0_i32, %c0_i32_0 : i32, i32, i32
  }
  func.func @transform_1(%arg0: i32) -> (i32, i32) {
    %c0_i32 = arith.constant 0 : i32
    %c0_i32_0 = arith.constant 0 : i32
    %c0_i32_1 = arith.constant 0 : i32
    return %c0_i32, %c0_i32_0 : i32, i32
  }
  func.func @transform_2(%arg0: i32) -> (i32, i32) {
    %c0_i32 = arith.constant 0 : i32
    %c0_i32_0 = arith.constant 0 : i32
    %c0_i32_1 = arith.constant 0 : i32
    return %c0_i32, %c0_i32_0 : i32, i32
  }
  func.func @transform_3(%arg0: i32) -> (i32, i32) {
    %c0_i32 = arith.constant 0 : i32
    %c0_i32_0 = arith.constant 0 : i32
    %c0_i32_1 = arith.constant 0 : i32
    return %c0_i32, %c0_i32_0 : i32, i32
  }
  func.func @transform_4(%arg0: i32) -> (i32, i32) {
    %c0_i32 = arith.constant 0 : i32
    %c0_i32_0 = arith.constant 0 : i32
    %c0_i32_1 = arith.constant 0 : i32
    return %c0_i32, %c0_i32_0 : i32, i32
  }
  func.func @transform_5(%arg0: i32) -> (i32, i32, i32) {
    %c0_i32 = arith.constant 0 : i32
    %c0_i32_0 = arith.constant 0 : i32
    %c0_i32_1 = arith.constant 0 : i32
    return %arg0, %c0_i32, %c0_i32_0 : i32, i32, i32
  }
}

</mosaic_0001>

<bundles_post_ra>
// kernel: tpu_custom_call.1
= control target key start
LH: loop header
LB: loop body
LE: loop exit
PB: predicated region body
PF: predicated region fallthrough
CT: control target
= control target key end

     0   :  { %10 = vsyncpa [#allocation3], 0  ;;  %s1134_s0 = inlined_call_operand.hbm [shape: f32[2,48,256], index: 0, kind: input, shape index: {}]   ;;  %s1135_s1 = inlined_call_operand.vmem [shape: f32[48,2], index: 1, kind: input, shape index: {}]   ;;  %s1136_s2 = inlined_call_operand.vmem [shape: f32[1,2], index: 2, kind: input, shape index: {}]   ;;  %s1137_s3 = inlined_call_operand.vmem [shape: f32[2,48], index: 3, kind: input, shape index: {}]   ;;  %s1138_s4 = inlined_call_operand.vmem [shape: f32[1,48], index: 4, kind: input, shape index: {}]   ;;  %s1139_s5 = inlined_call_operand.hbm [shape: f32[2,48,256], index: 5, kind: output, shape index: {}]  }
   0x1   :  { %12 = vsyncpa [#allocation3 + $0x1], 0 }
   0x2   :  { %13 = vsyncpa [#allocation4], 0 }
   0x3   :  { %15 = vsyncpa [#allocation4 + $0x1], 0  ;;  %s890_s18 = smov 0   ;;  %s892_s19 = smov 0  }
   0x4   :  { %s894_s20 = smov 0   ;;  %s896_s21 = smov 0  }
   0x5 LB: > { %s911_s22 = sadd.s32 4294967295, %s849_s21   ;;  %s637_s23 = sadd.s32 4294967294, %s849_s21   ;;  %s849_s21 = sphi %s896_s21, %s1151_s21   ;;  %s845_s20 = sphi %s894_s20, %s1150_s20   ;;  %s841_s19 = sphi %s892_s19, %s1149_s19   ;;  %s837_s18 = sphi %s890_s18, %s1148_s18  }
   0x6   : > { %s915_s24 = sadd.s32 1, %s849_s21   ;;  %s28_s25 = sadd.s32 1, %s845_s20 }
   0x7   : > { %s25_s26 = ssub.s32 %s849_s21, %s915_s24  ;;  %p35_p0 = scmp.ne.s32.totalorder %s845_s20, %s841_s19 }
   0x8   : > { %p26_p1 = scmp.eq.s32.totalorder %s25_s26, 0  ;;  %p36_p2 = scmp.eq.s32.totalorder %s849_s21, 0 }
   0x9   : > { %p41_p3 = scmp.ne.s32.totalorder %s841_s19, %s837_s18  ;;  %p42_p4 = scmp.eq.s32.totalorder %s911_s22, 0 }
   0xa   : > { %s927_s27 = scalar_select %p26_p1, %s845_s20, %s28_s25  }
   0xb   : > { %p37_p5 = por %p36_p2, %p35_p0  ;;  %p929_p6 = por %p42_p4, %p41_p3 }
   0xc   : > { %p149_p7 = scmp.eq.s32.totalorder %s911_s22, 1  ;;  %p155_p8 = scmp.eq.s32.totalorder %s637_s23, 1 }
   0xd   : > { %p704_p10 = scmp.lt.s32.totalorder %s849_s21, 2  ;;  %s187_s6 = sand.u32 1, %s845_s20  }
   0xe   : > { %p936_p11 = por %p149_p7, %p35_p0  ;;  %p940_p12 = por %p155_p8, %p41_p3 }
   0xf   : > { %s689_s7 = smul.u32 1536, %s849_s21  ;;  %p951_p13 = pnand %p704_p10, %p37_p5 }
  0x10   : > { %s1142_s29 = scalar_select %p936_p11, 1, 0 }
  0x11   : > { %s1143_s30 = scalar_select %p940_p12, 1, 0 }
  0x12   : > { %s688_s8 = smul.u32 96, %s187_s6  ;;  %s949_s11 = scalar_lea.hbm %s1134_s0, %s689_s7 }
  0x13   : > { %s957_s15 = scalar_lea.sflag [#allocation3], %s187_s6  ;;  %s753_s16 = scalar_lea.hbm %s949_s11, 1536 }
  0x14   : > { %s191_s13 = scalar_lea.vmem [#allocation2], %s688_s8  ;;  %p754_p0 = scmp.ne.s32.totalorder %s949_s11, %s753_s16 }
  0x15   : > { %s198_s14 = sshll.u32 %s191_s13, 4  ;;  %p755_p1 = pneg %p951_p13  ;;  %s955_s14 = int_to_ptr.vmem [resolvable:$true] %s198_s14 }
  0x16   : > { %s758_s25 = scalar_lea.hbm %s1134_s0, 3072  ;;  %p759_p4 = scmp.lt.u32.totalorder %s949_s11, %s1134_s0 }
  0x17   : > { %p756_p2 = pnand %p755_p1, %p754_p0  ;;  %p760_p5 = scmp.lt.u32.totalorder %s758_s25, %s753_s16 }
  0x18   : > { %p762_p8 = scmp.lt.u32.totalorder %s753_s16, %s949_s11 }
  0x19   : > { %p757_p3 = pneg %p756_p2  ;;  %p761_p7 = por %p760_p5, %p759_p4 }
  0x1b   : > { %p763_p10 = por %p762_p8, %p761_p7 }
  0x1d   : > { %p764_p9 = pnand %p763_p10, %p757_p3 }
  0x1f   : > { %767 = shalt.err (!%p764_p9)
}
  0x20   : > { %s768_s6 = scalar_lea.vmem %s955_s14, 1536  ;;  %s851_s8 = smov [#allocation2]  }
  0x21   : > { %p769_p0 = scmp.ne.s32.totalorder %s955_s14, %s768_s6  ;;  %s773_s9 = sshll.u32 %s851_s8, 4  ;;  %s774_s9 = int_to_ptr.vmem [resolvable:$false] %s773_s9 }
  0x22   : > { %s775_s10 = scalar_lea.vmem %s774_s9, 3072  ;;  %p776_p11 = scmp.lt.s32.totalorder %s955_s14, %s774_s9 }
  0x23   : > { %p771_p2 = pnand %p769_p0, %p755_p1  ;;  %p777_p4 = scmp.lt.s32.totalorder %s775_s10, %s768_s6 }
  0x25   : > { %p772_p12 = pneg %p771_p2  ;;  %p778_p5 = por %p777_p4, %p776_p11 }
  0x27   : > { %p779_p7 = pnand %p778_p5, %p772_p12 }
  0x29   : > { %782 = shalt.err (!%p779_p7)
}
  0x2a   : > { %s852_s13 = smov 256   ;;  %s853_s16 = smov 16  }
  0x2b   : > { %699 = dma.hbm_to_vmem [thread:$0]  (!%p951_p13), %s949_s11, 1536, %s955_s14, %s957_s15, %s852_s13, %s852_s13, %s853_s16  }
  0x2c   : > { %p641_p9 = scmp.ge.s32.totalorder %s849_s21, 1  ;;  %p206_p1 = scmp.lt.s32.totalorder %s849_s21, 3 }
  0x2e   : > { %p207_p3 = pnand %p641_p9, %p206_p1 }
  0x2f   : > { %s988_s17 = sand.u32 (!%p207_p3), 1, %s841_s19  }
  0x30   : > { %210 = sbr.rel (%p207_p3) target bundleno = 843 (0x34b), region = 40  ;;  %s213_s25 = scalar_lea.sflag (!%p207_p3), [#allocation3], %s988_s17 }
  0x31   : > { %s690_s23 = smul.u32 (!%p207_p3), 96, %s988_s17 }
  0x33   : > { %s216_s26 = scalar_lea.vmem (!%p207_p3), [#allocation2], %s690_s23 }
  0x37   : > { %828 = dma.done.wait (%p929_p6), %s213_s25, 1536  }
  0x38   : > { %830 = vsyncadd (%p929_p6), %s213_s25, 4294965760  ;;  %v998_v0 = vld [vmem:[%s216_s26] sm:$0xff]  ;;  %v1000_v1 = vld [vmem:[%s216_s26 + $0x8] sm:$0xff]  ;;  %v854_v21 = vmov 0.0|0.0   ;;  %vm855_vm0 = vmmov 0   ;;  %v856_v28 = vmov 0.0   ;;  %v292_v29 = vlaneseq }
  0x39   : > { %v1002_v2 = vld [vmem:[%s216_s26 + $0x20] sm:$0xff]  ;;  %v255_v3 = vadd.f32 %v1000_v1, %v998_v0  ;;  %v1006_v4 = vld [vmem:[%s216_s26 + $0x28] sm:$0xff]  ;;  %v1008_v5 = vld [vmem:[%s216_s26 + $0x10] sm:$0xff]  ;;  %679 = vmatprep.subr.bf16.mxu0 %v854_v21  ;;  %671 = vmatprep.mubr.msk.f32.mxu0 %vm855_vm0, %v856_v28  ;;  %vm303_vm1 = vcmask 130112   ;;  %vm310_vm2 = vcmask 195712   ;;  %vm317_vm3 = vcmask 261312  }
  0x3a   : > { %v1010_v6 = vld [vmem:[%s216_s26 + $0x18] sm:$0xff]  ;;  %v261_v7 = vadd.f32 %v1006_v4, %v1002_v2  ;;  %v1014_v8 = vld [vmem:[%s216_s26 + $0x30] sm:$0xff]  ;;  %v1022_v12 = vld [vmem:[%s216_s26 + $0x40] sm:$0xff]  ;;  %674 = vmatprep.subr.mxu1 %v856_v28  ;;  %676 = vmatprep.mubr.msk.f32.mxu1 %vm855_vm0, %v856_v28  ;;  %v293_v30 = vand.u32 127, %v292_v29  ;;  %v1052_v31 = vshrl.u32 %v292_v29, 7  ;;  %vm324_vm4 = vcmask 326912  }
  0x3b   : > { %v1016_v9 = vld [vmem:[%s216_s26 + $0x38] sm:$0xff]  ;;  %256 = vadd.xlane.f32.xlu0 %v255_v3  ;;  %v258_v10 = vadd.f32 %v1010_v6, %v1008_v5  ;;  %v1024_v13 = vld [vmem:[%s216_s26 + $0x48] sm:$0xff]  ;;  %v1026_v14 = vld [vmem:[%s216_s26 + $0x50] sm:$0xff]  ;;  %vm331_vm5 = vcmask 392512   ;;  %vm333_vm6 = vcmask 392192   ;;  %vm419_vm7 = vcmask 1041408  }
  0x3c   : > { %262 = vadd.xlane.f32.xlu1 %v261_v7  ;;  %v264_v11 = vadd.f32 %v1016_v9, %v1014_v8  ;;  %v1028_v15 = vld [vmem:[%s216_s26 + $0x58] sm:$0xff]  ;;  %v267_v16 = vadd.f32 %v1024_v13, %v1022_v12  ;;  %v279_v18 = vld [vmem:[%s1135_s1] sm:$0xff]  ;;  %v280_v19 = vld [vmem:[%s1135_s1 + $0x8] sm:$0xff]  ;;  %v298_v32 = vadd.s32 4294967288, %v293_v30  ;;  %v305_v34 = vadd.s32 4294967280, %v293_v30  ;;  %s242_s15 = scalar_lea.vmem [#allocation5], %s690_s23 }
  0x3d   : > { %v270_v17 = vadd.f32 %v1028_v15, %v1026_v14  ;;  %v680_v20 = vpack.c.bf16 %v280_v19, %v279_v18  ;;  %v281_v22 = vld [vmem:[%s1135_s1 + $0x10] sm:$0xff]  ;;  %v282_v23 = vld [vmem:[%s1135_s1 + $0x18] sm:$0xff]  ;;  %v283_v25 = vld [vmem:[%s1135_s1 + $0x20] sm:$0xff]  ;;  %v312_v35 = vadd.s32 4294967272, %v293_v30  ;;  %v296_v37 = vsub.s32 %v293_v30, %v1052_v31  ;;  %s691_s23 = smul.u32 1536, %s911_s22  ;;  %s564_s7 = sshll.u32 %s242_s15, 4  ;;  %s1088_s7 = int_to_ptr.vmem [resolvable:$true] %s564_s7 }
  0x3e   : > { %v683_v24 = vpack.c.bf16 %v282_v23, %v281_v22  ;;  %v284_v26 = vld [vmem:[%s1135_s1 + $0x28] sm:$0xff]  ;;  %v301_v39 = vsub.s32 %v298_v32, %v1052_v31  ;;  %v319_v40 = vadd.s32 4294967264, %v293_v30  ;;  %v308_v41 = vsub.s32 %v305_v34, %v1052_v31  ;;  %s551_s22 = scalar_lea.sflag [#allocation4], %s988_s17  ;;  %s783_s10 = scalar_lea.vmem %s1088_s7, 1536 }
  0x3f   : > { %259 = vadd.xlane.f32.xlu0 %v258_v10  ;;  %681 = vmatpush3.bf16.msra.mxu0 %v680_v20  ;;  %v686_v27 = vpack.c.bf16 %v284_v26, %v283_v25  ;;  %v315_v44 = vsub.s32 %v312_v35, %v1052_v31  ;;  %v326_v45 = vadd.s32 4294967256, %v293_v30  ;;  %v413_v10 = vld [vmem:[%s1137_s3] sm:$0x3]  ;;  %vm415_vm8 = vcmask 15360   ;;  %s1086_s9 = scalar_lea.hbm %s1139_s5, %s691_s23  ;;  %p784_p6 = scmp.ne.s32.totalorder %s1088_s7, %s783_s10 }
  0x40   : > { %265 = vadd.xlane.f32.xlu1 %v264_v11  ;;  %682 = vmatprep.subr.bf16.mxu0 %v854_v21  ;;  %v322_v51 = vsub.s32 %v319_v40, %v1052_v31  ;;  %v285_v11 = vld [vmem:[%s1136_s2] sm:$0x1]  ;;  %v501_v32 = vsub.s32 0, %v1052_v31  ;;  %p1145_p11 = scmp.ne.s32.totalorder %s1142_s29, 0  ;;  %s857_s13 = smov [#allocation5]  }
  0x41   : > { %v329_v55 = vsub.s32 %v326_v45, %v1052_v31  ;;  %675 = vmatpush3.msk.msra.mxu1 %vm419_vm7, %v413_v10  ;;  %s787_s16 = sshll.u32 %s857_s13, 4  ;;  %s788_s16 = int_to_ptr.vmem [resolvable:$false] %s787_s16 }
  0x42   : > { %p785_p12 = pnand %p784_p6, %p1145_p11  ;;  %s789_s25 = scalar_lea.vmem %s788_s16, 3072 }
  0x43   : > { %268 = vadd.xlane.f32.xlu0 %v267_v16  ;;  %684 = vmatpush3.bf16.msra.mxu0 %v683_v24  ;;  %v414_v24 = vld [vmem:[%s1138_s4] sm:$0x1]  ;;  %p790_p8 = scmp.lt.s32.totalorder %s1088_s7, %s788_s16  ;;  %p791_p10 = scmp.lt.s32.totalorder %s789_s25, %s783_s10 }
  0x44   : > { %271 = vadd.xlane.f32.xlu1 %v270_v17  ;;  %685 = vmatprep.subr.bf16.mxu0 %v854_v21  ;;  %p786_p13 = pneg %p785_p12 }
  0x45   : > { %p792_p0 = por %p791_p10, %p790_p8 }
  0x47   : > { %687 = vmatpush3.bf16.msra.mxu0 %v686_v27  ;;  %p793_p2 = pnand %p792_p0, %p786_p13 }
  0xc8   : > { %v257_v33 = vpop.xlane.xlu0 %256 }
  0xc9   : > { %v263_v36 = vpop.xlane.xlu1 %262  ;;  %v273_v38 = vmul.f32 0.00390625, %v257_v33 }
  0xca   : > { %v275_v42 = vmul.f32 0.00390625, %v263_v36 }
  0xcb   : > { %v297_v49 = vrot.slane %v273_v38, %v296_v37 }
  0xcc   : > { %v260_v43 = vpop.xlane.xlu0 %259  ;;  %v309_v52 = vrot.slane %v275_v42, %v308_v41 }
  0xcd   : > { %v274_v46 = vmul.f32 0.00390625, %v260_v43  ;;  %v266_v47 = vpop.xlane.xlu1 %265 }
  0xce   : > { %v276_v48 = vmul.f32 0.00390625, %v266_v47 }
  0xcf   : > { %v302_v50 = vrot.slane %v274_v46, %v301_v39 }
  0xd0   : > { %v316_v53 = vrot.slane %v276_v48, %v315_v44  ;;  %v269_v54 = vpop.xlane.xlu0 %268 }
  0xd1   : > { %v304_v56 = vsel %vm303_vm1, %v302_v50, %v297_v49  ;;  %v277_v57 = vmul.f32 0.00390625, %v269_v54  ;;  %v272_v58 = vpop.xlane.xlu1 %271 }
  0xd2   : > { %v311_v59 = vsel %vm310_vm2, %v309_v52, %v304_v56  ;;  %v278_v60 = vmul.f32 0.00390625, %v272_v58 }
  0xd3   : > { %v318_v61 = vsel %vm317_vm3, %v316_v53, %v311_v59  ;;  %v323_v62 = vrot.slane %v277_v57, %v322_v51 }
  0xd4   : > { %v330_v63 = vrot.slane %v278_v60, %v329_v55 }
  0xd5   : > { %v325_v3 = vsel %vm324_vm4, %v323_v62, %v318_v61 }
  0xd6   : > { %v332_v7 = vsel %vm331_vm5, %v330_v63, %v325_v3 }
  0xd7   : > { %672 = vmatmul.mubr.msk.f32.vlgmr.msra.gmra.mrb[0].mxu0 %vm333_vm6, %v332_v7 }
 0x1aa   : > { %v402_v16 = vpop.f32.mrb[0].mxu0 }
 0x1ab   : > { %v403_v17 = vadd.f32 %v402_v16, %v285_v11  ;;  %v673_v18 = vpop.f32.mrb[1].mxu0 }
 0x1ad   : > { %v643_v19 = vmul.f32 -1.442695, %v403_v17 }
 0x1af   : > { %745 = vpow2.f32 %v643_v19 }
 0x1b9   : > { %v746_v20 = vpop.eup %745 }
 0x1ba   : > { %v409_v21 = vadd.f32 1.0, %v746_v20 }
 0x1bc   : > { %747 = vrcp.f32 %v409_v21 }
 0x1c6   : > { %v748_v22 = vpop.eup %747 }
 0x1c7   : > { %v412_v23 = vmul.f32 %v748_v22, %v403_v17 }
 0x1c9   : > { %677 = vmatmul.mubr.msk.f32.vlgmr.msra.gmra.mrb[0].mxu1 %vm415_vm8, %v412_v23 }
 0x29c   : > { %v489_v25 = vpop.f32.mrb[0].mxu1 }
 0x29d   : > { %v490_v26 = vadd.f32 %v489_v25, %v414_v24  ;;  %v678_v27 = vpop.f32.mrb[1].mxu1 }
 0x29f   : > { %v646_v28 = vmul.f32 -1.442695, %v490_v26 }
 0x2a1   : > { %749 = vpow2.f32 %v646_v28 }
 0x2ab   : > { %v750_v29 = vpop.eup %749 }
 0x2ac   : > { %v496_v30 = vadd.f32 1.0, %v750_v29 }
 0x2ae   : > { %751 = vrcp.f32 %v496_v30 }
 0x2b8   : > { %v752_v33 = vpop.eup %751 }
 0x2b9   : > { %v502_v34 = vrot.slane %v752_v33, %v501_v32 }
 0x2bb   : > { %508 = vbcast.lane.b32.xlu1 %v502_v34, 264  ;;  %504 = vbcast.lane.b32.xlu0 %v502_v34, 256 }
 0x2bf   : > { %512 = vbcast.lane.b32.xlu1 %v502_v34, 272  ;;  %520 = vbcast.lane.b32.xlu0 %v502_v34, 288 }
 0x2c3   : > { %516 = vbcast.lane.b32.xlu1 %v502_v34, 280 }
 0x2c7   : > { %524 = vbcast.lane.b32.xlu1 %v502_v34, 296 }
 0x32d   : > { %v509_v35 = vpop.permute.xlu1 %508  ;;  %v505_v36 = vpop.permute.xlu0 %504 }
 0x32e   : > { %v528_v37 = vmul.f32 %v509_v35, %v1008_v5  ;;  %v529_v38 = vmul.f32 %v509_v35, %v1010_v6  ;;  %v526_v39 = vmul.f32 %v505_v36, %v998_v0  ;;  %v527_v40 = vmul.f32 %v505_v36, %v1000_v1 }
 0x330   : > { %540 = vst [vmem:[%s242_s15 + $0x10] sm:$0xff] %v528_v37  ;;  %541 = vst [vmem:[%s242_s15 + $0x18] sm:$0xff] %v529_v38 }
 0x331   : > { %538 = vst [vmem:[%s242_s15] sm:$0xff] %v526_v39  ;;  %539 = vst [vmem:[%s242_s15 + $0x8] sm:$0xff] %v527_v40  ;;  %v513_v31 = vpop.permute.xlu1 %512  ;;  %v521_v41 = vpop.permute.xlu0 %520 }
 0x332   : > { %v530_v42 = vmul.f32 %v513_v31, %v1002_v2  ;;  %v531_v43 = vmul.f32 %v513_v31, %v1006_v4  ;;  %v534_v5 = vmul.f32 %v521_v41, %v1022_v12  ;;  %v535_v6 = vmul.f32 %v521_v41, %v1024_v13 }
 0x334   : > { %542 = vst [vmem:[%s242_s15 + $0x20] sm:$0xff] %v530_v42  ;;  %543 = vst [vmem:[%s242_s15 + $0x28] sm:$0xff] %v531_v43 }
 0x335   : > { %546 = vst [vmem:[%s242_s15 + $0x40] sm:$0xff] %v534_v5  ;;  %547 = vst [vmem:[%s242_s15 + $0x48] sm:$0xff] %v535_v6  ;;  %v517_v0 = vpop.permute.xlu1 %516 }
 0x336   : > { %v532_v1 = vmul.f32 %v517_v0, %v1014_v8  ;;  %v533_v44 = vmul.f32 %v517_v0, %v1016_v9 }
 0x338   : > { %544 = vst [vmem:[%s242_s15 + $0x30] sm:$0xff] %v532_v1  ;;  %545 = vst [vmem:[%s242_s15 + $0x38] sm:$0xff] %v533_v44 }
 0x339   : > { %v525_v2 = vpop.permute.xlu1 %524 }
 0x33a   : > { %v536_v4 = vmul.f32 %v525_v2, %v1026_v14  ;;  %v537_v8 = vmul.f32 %v525_v2, %v1028_v15 }
 0x33c   : > { %548 = vst [vmem:[%s242_s15 + $0x50] sm:$0xff] %v536_v4  ;;  %549 = vst [vmem:[%s242_s15 + $0x58] sm:$0xff] %v537_v8 }
 0x33d   : > { %796 = shalt.err (!%p793_p2)
}
 0x33e   : > { %s797_s26 = scalar_lea.hbm %s1086_s9, 1536  ;;  %s801_s12 = scalar_lea.hbm %s1139_s5, 3072 }
 0x33f   : > { %p798_p4 = scmp.ne.s32.totalorder %s1086_s9, %s797_s26  ;;  %p802_p9 = scmp.lt.u32.totalorder %s1086_s9, %s1139_s5 }
 0x340   : > { %p803_p1 = scmp.lt.u32.totalorder %s801_s12, %s797_s26  ;;  %p805_p6 = scmp.lt.u32.totalorder %s797_s26, %s1086_s9 }
 0x341   : > { %p799_p5 = pnand %p798_p4, %p1145_p11 }
 0x342   : > { %p804_p3 = por %p803_p1, %p802_p9 }
 0x343   : > { %p800_p7 = pneg %p799_p5 }
 0x344   : > { %p806_p12 = por %p805_p6, %p804_p3 }
 0x346   : > { %p807_p13 = pnand %p806_p12, %p800_p7 }
 0x348   : > { %810 = shalt.err (!%p807_p13)
}
 0x349   : > { %s858_s23 = smov 256   ;;  %s859_s6 = smov 16  }
 0x34a   : > { %694 = dma.vmem_to_hbm [thread:$0]  (%p1145_p11), %s1088_s7, 1536, %s1086_s9, %s551_s22, %s858_s23, %s858_s23, %s859_s6  }
 0x34b PF: > { %s579_s8 = sand.u32 1, %s837_s18   ;;  %p1146_p8 = scmp.ne.s32.totalorder %s1143_s30, 0 }
 0x34c   : > { %p1147_p10 = scmp.ge.s32.totalorder %s849_s21, 2  ;;  %s580_s10 = scalar_lea.sflag [#allocation4], %s579_s8 }
 0x34e   : > { %p701_p0 = pnand %p1147_p10, %p1146_p8 }
 0x350   : > { %832 = dma.done.wait (!%p701_p0), %s580_s10, 1536  }
 0x351   : > { %834 = vsyncadd (!%p701_p0), %s580_s10, 4294965760  ;;  %p18_p2 = scmp.ge.s32.totalorder %s915_s24, 4   ;;  %s1148_s18 = smov %s841_s19 }
 0x352   : > { %s1149_s19 = smov %s845_s20  ;;  %s1150_s20 = smov %s927_s27 }
 0x353   : > { %s1151_s21 = smov %s915_s24  ;;  %20 = sbr.rel (!%p18_p2) target bundleno = 5 (0x5), region = 85 }
 0x35a   :  { %585 = vsyncpa [#allocation3], 1 }
 0x35b   :  { %587 = vsyncpa [#allocation3 + $0x1], 1 }
 0x35c   :  { %588 = vsyncpa [#allocation4], 1 }
 0x35d   :  { %590 = vsyncpa [#allocation4 + $0x1], 1 }

</bundles_post_ra>
